<compile_context>
chip_gen: v6e
topology: v6e:2x2x1
jax: 0.10.0
libtpu: 0.0.40
codegen_flags: <defaults>
</compile_context>

<pallas_src>
import functools

import jax
import jax.numpy as jnp
from jax.experimental import pallas as pl
from jax.experimental.pallas import tpu as pltpu


def _se_kernel(x_ref, w1t_ref, b1_ref, w2t_ref, b2_ref, o_ref, *, inv_hw):
    # x_ref: (Nb, C, HW) block; weights/biases are full (un-tiled) blocks.
    x = x_ref[...]                                                       # (Nb, C, HW)

    # Squeeze: global mean over the spatial (lane) axis with f32 accumulation.
    s = jnp.sum(x, axis=-1, dtype=jnp.float32) * inv_hw                  # (Nb, C)

    # Excite: FC -> Swish -> FC -> Sigmoid (1x1 convs on a 1x1 feature map).
    # Weights arrive in the input dtype; upcast in-kernel (tiny) and accumulate f32.
    h = jnp.dot(s, w1t_ref[...].astype(jnp.float32),
                preferred_element_type=jnp.float32) + b1_ref[...]        # (Nb, w_se)
    h = h * jax.nn.sigmoid(h)                                            # Swish

    g = jnp.dot(h, w2t_ref[...].astype(jnp.float32),
                preferred_element_type=jnp.float32) + b2_ref[...]        # (Nb, C)
    g = jax.nn.sigmoid(g)                                                # Sigmoid

    # Scale: broadcast the gate over the spatial axis, multiply in input dtype
    # (bf16 path keeps half the vreg / VMEM pressure of an f32 upcast).
    o_ref[...] = x * g[:, :, None].astype(x.dtype)


def _vmem_capacity_bytes():
    try:
        return int(pltpu.get_tpu_info().vmem_capacity_bytes)
    except Exception:
        return 64 * 1024 * 1024  # conservative: v7x per-TensorCore VMEM


def _choose_nb(N, per_image_bytes, fixed_bytes, data_budget_bytes,
               *, target_block_bytes=2 << 20, max_block_bytes=4 << 20,
               min_steps=8):
    """Images per grid step.

    Targets ~1-4 MiB input blocks (>= ~85% of HBM roofline, per measured
    tiling data) while keeping >= min_steps grid steps when the batch allows
    it (>= 2 steps per TensorCore on a 2-core part) so the pipeline can
    overlap fetch of step i+1 with writeback of step i.
    """
    nb = int(max(1, min(N, target_block_bytes // max(1, per_image_bytes))))
    # Cap the block size (mem-bound: bigger blocks buy nothing past ~1-4 MiB).
    while nb > 1 and nb * per_image_bytes > max_block_bytes:
        nb -= 1
    # Keep enough grid steps for DMA/compute overlap and megacore splitting.
    want_steps = min(N, min_steps)
    while nb > 1 and -(-N // nb) < want_steps:
        nb -= 1
    # VMEM fit: double-buffered input + output blocks plus resident weights/biases.
    while nb > 1 and 4 * nb * per_image_bytes + fixed_bytes > data_budget_bytes:
        nb -= 1
    return nb


def se_forward(x_nchw, w1, b1, w2, b2):
    """x_nchw: (N, C, H, W); w1: (w_se, C); b1: (w_se,); w2: (C, w_se); b2: (C,)."""
    N, C, H, W = x_nchw.shape
    HW = H * W
    w_se = w1.shape[0]

    # No padding / slicing: last block dim == full HW (exempt from 128 rule);
    # the tail vreg store is simply masked.
    x = x_nchw.reshape(N, C, HW)
    itemsize = jnp.dtype(x.dtype).itemsize

    per_image_bytes = C * HW * itemsize
    # Double-buffered weights (input dtype) + f32 biases.
    fixed_bytes = 2 * (2 * C * w_se * itemsize) + 2 * 4 * (C + w_se + 2)

    vmem_cap = _vmem_capacity_bytes()
    data_budget = min(vmem_cap // 2, 32 * 1024 * 1024)
    Nb = _choose_nb(N, per_image_bytes, fixed_bytes, data_budget)
    grid = (-(-N // Nb),)  # cdiv: partial last batch block is masked by Pallas

    # Pre-transpose the 1x1-conv weights so both FCs are plain (rows,K)x(K,cols)
    # matmuls; keep them in the input dtype to halve their VMEM residency.
    w1t = jnp.asarray(w1, x.dtype).T                     # (C, w_se)
    w2t = jnp.asarray(w2, x.dtype).T                     # (w_se, C)
    b1r = jnp.asarray(b1, jnp.float32).reshape(1, w_se)
    b2r = jnp.asarray(b2, jnp.float32).reshape(1, C)

    # Scoped-VMEM limit: what the blocks actually need + headroom for Mosaic
    # internal scratch, never above (capacity - headroom) of the current part.
    needed = 4 * Nb * per_image_bytes + fixed_bytes
    vmem_limit = int(min(needed + (8 << 20), max(vmem_cap - (8 << 20), 16 << 20)))
    vmem_limit = max(vmem_limit, 16 << 20)

    kernel = functools.partial(_se_kernel, inv_hw=1.0 / HW)

    out = pl.pallas_call(
        kernel,
        out_shape=jax.ShapeDtypeStruct((N, C, HW), x.dtype),
        grid_spec=pltpu.PrefetchScalarGridSpec(
            num_scalar_prefetch=0,
            grid=grid,
            in_specs=[
                pl.BlockSpec((Nb, C, HW), lambda n: (n, 0, 0)),
                pl.BlockSpec((C, w_se), lambda n: (0, 0)),
                pl.BlockSpec((1, w_se), lambda n: (0, 0)),
                pl.BlockSpec((w_se, C), lambda n: (0, 0)),
                pl.BlockSpec((1, C), lambda n: (0, 0)),
            ],
            out_specs=pl.BlockSpec((Nb, C, HW), lambda n: (n, 0, 0)),
        ),
        compiler_params=pltpu.CompilerParams(
            dimension_semantics=("parallel",),
            vmem_limit_bytes=vmem_limit,
        ),
    )(x, w1t, b1r, w2t, b2r)

    return out.reshape(N, C, H, W)


def _reference(x, w1, b1, w2, b2):
    # Pure-JAX reference mirroring the PyTorch forward.
    s = jnp.mean(x.astype(jnp.float32), axis=(2, 3), keepdims=True)    # (N, C, 1, 1)
    h = jnp.einsum("oc,nchw->nohw", w1, s) + b1[None, :, None, None]   # (N, w_se, 1, 1)
    h = h * jax.nn.sigmoid(h)
    g = jnp.einsum("co,nohw->nchw", w2, h) + b2[None, :, None, None]   # (N, C, 1, 1)
    g = jax.nn.sigmoid(g)
    return (x.astype(jnp.float32) * g).astype(x.dtype)


if __name__ == "__main__":
    key = jax.random.PRNGKey(0)
    k_x, k_w1, k_b1, k_w2, k_b2 = jax.random.split(key, 5)

    N, C, w_se = 2, 16, 4

    # Conv2d(w_in, w_se, 1) weight is (w_se, w_in, 1, 1) -> squeezed to (w_se, w_in).
    w1 = jax.random.normal(k_w1, (w_se, C), dtype=jnp.float32) * 0.1
    b1 = jax.random.normal(k_b1, (w_se,), dtype=jnp.float32) * 0.1
    w2 = jax.random.normal(k_w2, (C, w_se), dtype=jnp.float32) * 0.1
    b2 = jax.random.normal(k_b2, (C,), dtype=jnp.float32) * 0.1

    # Case 1: lane-dense spatial size (HW = 256, multiple of 128).
    x1 = jax.random.normal(k_x, (N, C, 16, 16), dtype=jnp.float32)
    out1 = se_forward(x1, w1, b1, w2, b2)
    jax.block_until_ready(out1)
    ref1 = _reference(x1, w1, b1, w2, b2)
    assert out1.shape == x1.shape
    assert jnp.allclose(out1, ref1, atol=1e-5, rtol=1e-5), "mismatch vs reference (HW=256)"

    # Case 2: non-multiple-of-128 spatial size (HW = 49): masked tail store path.
    x2 = jax.random.normal(k_x, (N, C, 7, 7), dtype=jnp.float32)
    out2 = se_forward(x2, w1, b1, w2, b2)
    jax.block_until_ready(out2)
    ref2 = _reference(x2, w1, b1, w2, b2)
    assert out2.shape == x2.shape
    assert jnp.allclose(out2, ref2, atol=1e-5, rtol=1e-5), "mismatch vs reference (HW=49)"

    print("KERNEL_OK")
</pallas_src>

<mosaic_0001>
module attributes {stable_mosaic.version = 11 : i64} {
  func.func @_se_kernel(%arg0: i32, %arg1: memref<1x16x256xf32, #tpu.memory_space<vmem>>, %arg2: memref<16x4xf32, #tpu.memory_space<vmem>>, %arg3: memref<1x4xf32, #tpu.memory_space<vmem>>, %arg4: memref<4x16xf32, #tpu.memory_space<vmem>>, %arg5: memref<1x16xf32, #tpu.memory_space<vmem>>, %arg6: memref<1x16x256xf32, #tpu.memory_space<vmem>>) attributes {dimension_semantics = [#tpu.dimension_semantics<parallel>], iteration_bounds = array<i64: 2>, scalar_prefetch = 0 : i64, scratch_operands = 0 : i64, tpu.core_type = #tpu.core_type<tc>, window_params = [{transform_indices = @transform_0, window_bounds = array<i64: 1, 16, 256>}, {pipeline_mode = #tpu.pipeline_mode<synchronous>, transform_indices = @transform_1, window_bounds = array<i64: 16, 4>}, {pipeline_mode = #tpu.pipeline_mode<synchronous>, transform_indices = @transform_2, window_bounds = array<i64: 1, 4>}, {pipeline_mode = #tpu.pipeline_mode<synchronous>, transform_indices = @transform_3, window_bounds = array<i64: 4, 16>}, {pipeline_mode = #tpu.pipeline_mode<synchronous>, transform_indices = @transform_4, window_bounds = array<i64: 1, 16>}, {transform_indices = @transform_5, window_bounds = array<i64: 1, 16, 256>}]} {
    %c0 = arith.constant 0 : index
    %c0_0 = arith.constant 0 : index
    %c0_1 = arith.constant 0 : index
    %0 = vector.load %arg1[%c0, %c0_0, %c0_1] : memref<1x16x256xf32, #tpu.memory_space<vmem>>, vector<1x16x256xf32>
    %cst = arith.constant dense<0.000000e+00> : vector<1x16xf32>
    %1 = vector.multi_reduction <add>, %0, %cst [2] : vector<1x16x256xf32> to vector<1x16xf32>
    %cst_2 = arith.constant 3.906250e-03 : f32
    %2 = vector.broadcast %cst_2 : f32 to vector<1x16xf32>
    %3 = arith.mulf %1, %2 : vector<1x16xf32>
    %c0_3 = arith.constant 0 : index
    %c0_4 = arith.constant 0 : index
    %4 = vector.load %arg2[%c0_3, %c0_4] : memref<16x4xf32, #tpu.memory_space<vmem>>, vector<16x4xf32>
    %cst_5 = arith.constant dense<0.000000e+00> : vector<1x4xf32>
    %5 = tpu.matmul %3, %4, %cst_5 {dimension_numbers = #tpu.dot_dimension_numbers<[1], [0], [0], [1], [0, 0, 1, 1], [], []>} : vector<1x16xf32>, vector<16x4xf32>, vector<1x4xf32> -> vector<1x4xf32>
    %c0_6 = arith.constant 0 : index
    %c0_7 = arith.constant 0 : index
    %6 = vector.load %arg3[%c0_6, %c0_7] : memref<1x4xf32, #tpu.memory_space<vmem>>, vector<1x4xf32>
    %7 = arith.addf %5, %6 : vector<1x4xf32>
    %8 = arith.negf %7 : vector<1x4xf32>
    %9 = math.exp %8 : vector<1x4xf32>
    %cst_8 = arith.constant 1.000000e+00 : f32
    %10 = vector.broadcast %cst_8 : f32 to vector<1x4xf32>
    %11 = arith.addf %10, %9 : vector<1x4xf32>
    %12 = arith.divf %10, %11 : vector<1x4xf32>
    %13 = arith.mulf %7, %12 : vector<1x4xf32>
    %c0_9 = arith.constant 0 : index
    %c0_10 = arith.constant 0 : index
    %14 = vector.load %arg4[%c0_9, %c0_10] : memref<4x16xf32, #tpu.memory_space<vmem>>, vector<4x16xf32>
    %cst_11 = arith.constant dense<0.000000e+00> : vector<1x16xf32>
    %15 = tpu.matmul %13, %14, %cst_11 {dimension_numbers = #tpu.dot_dimension_numbers<[1], [0], [0], [1], [0, 0, 1, 1], [], []>} : vector<1x4xf32>, vector<4x16xf32>, vector<1x16xf32> -> vector<1x16xf32>
    %c0_12 = arith.constant 0 : index
    %c0_13 = arith.constant 0 : index
    %16 = vector.load %arg5[%c0_12, %c0_13] : memref<1x16xf32, #tpu.memory_space<vmem>>, vector<1x16xf32>
    %17 = arith.addf %15, %16 : vector<1x16xf32>
    %18 = arith.negf %17 : vector<1x16xf32>
    %19 = math.exp %18 : vector<1x16xf32>
    %cst_14 = arith.constant 1.000000e+00 : f32
    %20 = vector.broadcast %cst_14 : f32 to vector<1x16xf32>
    %21 = arith.addf %20, %19 : vector<1x16xf32>
    %22 = arith.divf %20, %21 : vector<1x16xf32>
    %23 = vector.shape_cast %22 : vector<1x16xf32> to vector<1x16x1xf32>
    %24 = vector.broadcast %23 : vector<1x16x1xf32> to vector<1x16x256xf32>
    %25 = arith.mulf %0, %24 : vector<1x16x256xf32>
    %c0_15 = arith.constant 0 : index
    %c0_16 = arith.constant 0 : index
    %c0_17 = arith.constant 0 : index
    %26 = vector.load %arg6[%c0_15, %c0_16, %c0_17] : memref<1x16x256xf32, #tpu.memory_space<vmem>>, vector<1x16x256xf32>
    tpu.vector_store %arg6[%c0_15, %c0_16, %c0_17], %25 {strides = array<i32>} : memref<1x16x256xf32, #tpu.memory_space<vmem>>, vector<1x16x256xf32>,
    return
  }
  func.func @transform_0(%arg0: i32) -> (i32, i32, i32) {
    %c0_i32 = arith.constant 0 : i32
    %c0_i32_0 = arith.constant 0 : i32
    %c0_i32_1 = arith.constant 0 : i32
    return %arg0, %c0_i32, %c0_i32_0 : i32, i32, i32
  }
  func.func @transform_1(%arg0: i32) -> (i32, i32) {
    %c0_i32 = arith.constant 0 : i32
    %c0_i32_0 = arith.constant 0 : i32
    %c0_i32_1 = arith.constant 0 : i32
    return %c0_i32, %c0_i32_0 : i32, i32
  }
  func.func @transform_2(%arg0: i32) -> (i32, i32) {
    %c0_i32 = arith.constant 0 : i32
    %c0_i32_0 = arith.constant 0 : i32
    %c0_i32_1 = arith.constant 0 : i32
    return %c0_i32, %c0_i32_0 : i32, i32
  }
  func.func @transform_3(%arg0: i32) -> (i32, i32) {
    %c0_i32 = arith.constant 0 : i32
    %c0_i32_0 = arith.constant 0 : i32
    %c0_i32_1 = arith.constant 0 : i32
    return %c0_i32, %c0_i32_0 : i32, i32
  }
  func.func @transform_4(%arg0: i32) -> (i32, i32) {
    %c0_i32 = arith.constant 0 : i32
    %c0_i32_0 = arith.constant 0 : i32
    %c0_i32_1 = arith.constant 0 : i32
    return %c0_i32, %c0_i32_0 : i32, i32
  }
  func.func @transform_5(%arg0: i32) -> (i32, i32, i32) {
    %c0_i32 = arith.constant 0 : i32
    %c0_i32_0 = arith.constant 0 : i32
    %c0_i32_1 = arith.constant 0 : i32
    return %arg0, %c0_i32, %c0_i32_0 : i32, i32, i32
  }
}

</mosaic_0001>

<bundles_post_ra>
// kernel: tpu_custom_call.1
= control target key start
LH: loop header
LB: loop body
LE: loop exit
PB: predicated region body
PF: predicated region fallthrough
CT: control target
= control target key end

     0   :  { %10 = vsyncpa [#allocation3], 0  ;;  %s964_s0 = inlined_call_operand.hbm [shape: f32[2,16,256], index: 0, kind: input, shape index: {}]   ;;  %s965_s1 = inlined_call_operand.vmem [shape: f32[16,4], index: 1, kind: input, shape index: {}]   ;;  %s966_s2 = inlined_call_operand.vmem [shape: f32[1,4], index: 2, kind: input, shape index: {}]   ;;  %s967_s3 = inlined_call_operand.vmem [shape: f32[4,16], index: 3, kind: input, shape index: {}]   ;;  %s968_s4 = inlined_call_operand.vmem [shape: f32[1,16], index: 4, kind: input, shape index: {}]   ;;  %s969_s5 = inlined_call_operand.hbm [shape: f32[2,16,256], index: 5, kind: output, shape index: {}]  }
   0x1   :  { %12 = vsyncpa [#allocation3 + $0x1], 0 }
   0x2   :  { %13 = vsyncpa [#allocation4], 0 }
   0x3   :  { %15 = vsyncpa [#allocation4 + $0x1], 0  ;;  %s775_s18 = smov 0   ;;  %s777_s19 = smov 0  }
   0x4   :  { %s779_s20 = smov 0   ;;  %s781_s21 = smov 0  }
   0x5 LB: > { %s796_s22 = sadd.s32 4294967295, %s735_s21   ;;  %s545_s23 = sadd.s32 4294967294, %s735_s21   ;;  %s735_s21 = sphi %s781_s21, %s984_s21   ;;  %s731_s20 = sphi %s779_s20, %s983_s20   ;;  %s727_s19 = sphi %s777_s19, %s982_s19   ;;  %s723_s18 = sphi %s775_s18, %s981_s18  }
   0x6   : > { %s800_s24 = sadd.s32 1, %s735_s21   ;;  %s28_s25 = sadd.s32 1, %s731_s20 }
   0x7   : > { %s25_s26 = ssub.s32 %s735_s21, %s800_s24  ;;  %p35_p0 = scmp.ne.s32.totalorder %s731_s20, %s727_s19 }
   0x8   : > { %p26_p1 = scmp.eq.s32.totalorder %s25_s26, 0  ;;  %p36_p2 = scmp.eq.s32.totalorder %s735_s21, 0 }
   0x9   : > { %p41_p3 = scmp.ne.s32.totalorder %s727_s19, %s723_s18  ;;  %p42_p4 = scmp.eq.s32.totalorder %s796_s22, 0 }
   0xa   : > { %s812_s27 = scalar_select %p26_p1, %s731_s20, %s28_s25  }
   0xb   : > { %p814_p5 = por %p36_p2, %p35_p0  ;;  %p818_p6 = por %p42_p4, %p41_p3 }
   0xc   : > { %p149_p7 = scmp.eq.s32.totalorder %s796_s22, 1  ;;  %p155_p8 = scmp.eq.s32.totalorder %s545_s23, 1 }
   0xd   : > { %s973_s29 = scalar_select %p818_p6, 1, 0 }
   0xe   : > { %p595_p10 = scmp.lt.s32.totalorder %s735_s21, 2  ;;  %p825_p11 = por %p149_p7, %p35_p0 }
   0xf   : > { %p829_p12 = por %p155_p8, %p41_p3  ;;  %s187_s7 = sand.u32 1, %s731_s20  }
  0x10   : > { %s974_s30 = scalar_select %p825_p11, 1, 0 }
  0x11   : > { %s975_s6 = scalar_select %p829_p12, 1, 0 }
  0x12   : > { %s564_s8 = sshll.u32 %s735_s21, 9  ;;  %s548_s9 = sshll.u32 %s187_s7, 5 }
  0x13   : > { %s838_s12 = scalar_lea.hbm %s964_s0, %s564_s8  ;;  %s191_s13 = scalar_lea.vmem [#allocation2], %s548_s9 }
  0x14   : > { %s198_s14 = sshll.u32 %s191_s13, 4  ;;  %p842_p13 = pnand %p595_p10, %p814_p5  ;;  %s846_s14 = int_to_ptr.vmem [resolvable:$true] %s198_s14 }
  0x15   : > { %s848_s16 = scalar_lea.sflag [#allocation3], %s187_s7  ;;  %s643_s17 = scalar_lea.hbm %s838_s12, 512 }
  0x16   : > { %p644_p0 = scmp.ne.s32.totalorder %s838_s12, %s643_s17  ;;  %p645_p1 = pneg %p842_p13 }
  0x17   : > { %s648_s26 = scalar_lea.hbm %s964_s0, 1024  ;;  %p649_p4 = scmp.lt.s32.totalorder %s838_s12, %s964_s0 }
  0x18   : > { %p646_p2 = pnand %p645_p1, %p644_p0  ;;  %p650_p5 = scmp.lt.s32.totalorder %s648_s26, %s643_s17 }
  0x1a   : > { %p647_p3 = pneg %p646_p2  ;;  %p651_p7 = por %p650_p5, %p649_p4 }
  0x1c   : > { %p652_p8 = pnand %p651_p7, %p647_p3 }
  0x1e   : > { %655 = shalt.err (!%p652_p8)
}
  0x1f   : > { %s656_s7 = scalar_lea.vmem %s846_s14, 512  ;;  %s737_s9 = smov [#allocation2]  }
  0x20   : > { %p657_p10 = scmp.ne.s32.totalorder %s846_s14, %s656_s7  ;;  %s661_s10 = sshll.u32 %s737_s9, 4  ;;  %s662_s10 = int_to_ptr.vmem [resolvable:$false] %s661_s10 }
  0x21   : > { %s663_s11 = scalar_lea.vmem %s662_s10, 1024  ;;  %p664_p2 = scmp.lt.s32.totalorder %s846_s14, %s662_s10 }
  0x22   : > { %p659_p9 = pnand %p657_p10, %p645_p1  ;;  %p665_p12 = scmp.lt.s32.totalorder %s663_s11, %s656_s7 }
  0x24   : > { %p660_p0 = pneg %p659_p9  ;;  %p666_p11 = por %p665_p12, %p664_p2 }
  0x26   : > { %p667_p6 = pnand %p666_p11, %p660_p0 }
  0x28   : > { %670 = shalt.err (!%p667_p6)
}
  0x29   : > { %s738_s13 = smov 256   ;;  %s739_s17 = smov 16  }
  0x2a   : > { %590 = dma.hbm_to_vmem [thread:$0]  (!%p842_p13), %s838_s12, 512, %s846_s14, %s848_s16, %s738_s13, %s738_s13, %s739_s17  }
  0x2b   : > { %p551_p9 = scmp.ge.s32.totalorder %s735_s21, 1  ;;  %p206_p1 = scmp.lt.s32.totalorder %s735_s21, 3 }
  0x2d   : > { %p207_p3 = pnand %p551_p9, %p206_p1 }
  0x2e   : > { %s872_s23 = sand.u32 (!%p207_p3), 1, %s727_s19   ;;  %p977_p6 = scmp.ne.s32.totalorder (!%p207_p3), %s973_s29, 0 }
  0x2f   : > { %210 = sbr.rel (%p207_p3) target bundleno = 796 (0x31c), region = 40  ;;  %s552_s25 = sshll.u32 (!%p207_p3), %s872_s23, 5 }
  0x30   : > { %s213_s26 = scalar_lea.sflag (!%p207_p3), [#allocation3], %s872_s23  ;;  %s216_s28 = scalar_lea.vmem (!%p207_p3), [#allocation2], %s552_s25 }
  0x34   : > { %714 = dma.done.wait (%p977_p6), %s213_s26, 512  }
  0x35   : > { %716 = vsyncadd (%p977_p6), %s213_s26, 4294966784  ;;  %v882_v0 = vld [vmem:[%s216_s28] sm:$0xff]  ;;  %v884_v1 = vld [vmem:[%s216_s28 + $0x8] sm:$0xff]  ;;  %v740_v6 = vmov 0.0   ;;  %vm741_vm0 = vmmov 0   ;;  %v260_v9 = vlaneseq  ;;  %vm271_vm1 = vcmask 130112  }
  0x36   : > { %v886_v2 = vld [vmem:[%s216_s28 + $0x10] sm:$0xff]  ;;  %v247_v3 = vadd.f32 %v884_v1, %v882_v0  ;;  %v890_v4 = vld [vmem:[%s216_s28 + $0x18] sm:$0xff]  ;;  %571 = vmatprep.subr.mxu0 %v740_v6  ;;  %v256_v7 = vld [vmem:[%s965_s1 + $0x8] sm:$0xff]  ;;  %578 = vmatprep.subr.mxu1 %v740_v6  ;;  %vm273_vm2 = vcmask 130048   ;;  %vm359_vm3 = vcmask 1043456   ;;  %vm355_vm4 = vcmask 31744  }
  0x37   : > { %v250_v5 = vadd.f32 %v890_v4, %v886_v2  ;;  %572 = vmatpush3.msra.mxu0 %v256_v7  ;;  %v255_v8 = vld [vmem:[%s965_s1] sm:$0xff]  ;;  %575 = vmatprep.mubr.msk.f32.mxu0 %vm741_vm0, %v740_v6  ;;  %v261_v10 = vand.u32 127, %v260_v9  ;;  %v263_v11 = vshrl.u32 %v260_v9, 7  ;;  %s242_s13 = scalar_lea.vmem [#allocation5], %s552_s25  ;;  %s565_s26 = sshll.u32 %s796_s22, 9 }
  0x38   : > { %248 = vadd.xlane.f32.xlu0 %v247_v3  ;;  %573 = vmatprep.subr.mxu0 %v740_v6  ;;  %v353_v22 = vld [vmem:[%s967_s3] sm:$0xf]  ;;  %s472_s17 = sshll.u32 %s242_s13, 4  ;;  %s919_s25 = scalar_lea.hbm %s969_s5, %s565_s26  ;;  %s914_s17 = int_to_ptr.vmem [resolvable:$true] %s472_s17 }
  0x39   : > { %574 = vmatpush3.msra.mxu0 %v255_v8  ;;  %580 = vmatprep.mubr.msk.f32.mxu1 %vm741_vm0, %v740_v6  ;;  %v266_v12 = vadd.s32 4294967288, %v261_v10  ;;  %v264_v14 = vsub.s32 %v261_v10, %v263_v11  ;;  %v257_v23 = vld [vmem:[%s966_s2] sm:$0x1]  ;;  %v441_v39 = vsub.s32 0, %v263_v11  ;;  %s459_s22 = scalar_lea.sflag [#allocation4], %s872_s23  ;;  %s671_s12 = scalar_lea.vmem %s914_s17, 512 }
  0x3a   : > { %579 = vmatpush3.msk.msra.mxu1 %vm359_vm3, %v353_v22  ;;  %v354_v32 = vld [vmem:[%s968_s4] sm:$0x1]  ;;  %p672_p11 = scmp.ne.s32.totalorder %s914_s17, %s671_s12  ;;  %p978_p12 = scmp.ne.s32.totalorder %s974_s30, 0 }
  0x3b   : > { %v269_v16 = vsub.s32 %v266_v12, %v263_v11  ;;  %s742_s14 = smov [#allocation5]  }
  0x3c   : > { %251 = vadd.xlane.f32.xlu0 %v250_v5  ;;  %p673_p13 = pnand %p672_p11, %p978_p12  ;;  %s675_s15 = sshll.u32 %s742_s14, 4  ;;  %s676_s15 = int_to_ptr.vmem [resolvable:$false] %s675_s15 }
  0x3d   : > { %s677_s16 = scalar_lea.vmem %s676_s15, 1024  ;;  %p678_p5 = scmp.lt.s32.totalorder %s914_s17, %s676_s15 }
  0x3e   : > { %p674_p4 = pneg %p673_p13  ;;  %p679_p7 = scmp.lt.s32.totalorder %s677_s16, %s671_s12 }
  0x40   : > { %p680_p8 = por %p679_p7, %p678_p5 }
  0x42   : > { %p681_p10 = pnand %p680_p8, %p674_p4 }
  0xc1   : > { %v249_v13 = vpop.xlane.xlu0 %248 }
  0xc2   : > { %v253_v15 = vmul.f32 0.00390625, %v249_v13 }
  0xc4   : > { %v265_v19 = vrot.slane %v253_v15, %v264_v14 }
  0xc5   : > { %v252_v17 = vpop.xlane.xlu0 %251 }
  0xc6   : > { %v254_v18 = vmul.f32 0.00390625, %v252_v17 }
  0xc8   : > { %v270_v20 = vrot.slane %v254_v18, %v269_v16 }
  0xca   : > { %v272_v21 = vsel %vm271_vm1, %v270_v20, %v265_v19 }
  0xcb   : > { %576 = vmatmul.mubr.msk.f32.vlgmr.msra.gmra.mxu0 %vm273_vm2, %v272_v21 }
 0x18b   : > { %v342_v24 = vpop.f32.mrf.mxu0 }
 0x18c   : > { %v343_v25 = vadd.f32 %v342_v24, %v257_v23 }
 0x18d   : > { %v577_v26 = vpop.f32.mrf.mxu0 }
 0x18e   : > { %v555_v27 = vmul.f32 -1.442695, %v343_v25 }
 0x190   : > { %635 = vpow2.f32 %v555_v27 }
 0x19d   : > { %v636_v28 = vpop.eup %635 }
 0x19e   : > { %v349_v29 = vadd.f32 1.0, %v636_v28 }
 0x1a0   : > { %637 = vrcp.f32 %v349_v29 }
 0x1ad   : > { %v638_v30 = vpop.eup %637 }
 0x1ae   : > { %v352_v31 = vmul.f32 %v638_v30, %v343_v25 }
 0x1b0   : > { %581 = vmatmul.mubr.msk.f32.vlgmr.msra.gmra.mxu1 %vm355_vm4, %v352_v31 }
 0x270   : > { %v429_v33 = vpop.f32.mrf.mxu1 }
 0x271   : > { %v430_v34 = vadd.f32 %v429_v33, %v354_v32 }
 0x272   : > { %v582_v35 = vpop.f32.mrf.mxu1 }
 0x273   : > { %v558_v36 = vmul.f32 -1.442695, %v430_v34 }
 0x275   : > { %639 = vpow2.f32 %v558_v36 }
 0x282   : > { %v640_v37 = vpop.eup %639 }
 0x283   : > { %v436_v38 = vadd.f32 1.0, %v640_v37 }
 0x285   : > { %641 = vrcp.f32 %v436_v38 }
 0x292   : > { %v642_v40 = vpop.eup %641 }
 0x293   : > { %v442_v41 = vrot.slane %v642_v40, %v441_v39 }
 0x295   : > { %444 = vbcast.lane.b32.xlu1 %v442_v41, 256 }
 0x299   : > { %448 = vbcast.lane.b32.xlu1 %v442_v41, 264 }
 0x307   : > { %v445_v42 = vpop.permute.xlu1 %444 }
 0x308   : > { %v450_v43 = vmul.f32 %v445_v42, %v882_v0  ;;  %v451_v44 = vmul.f32 %v445_v42, %v884_v1 }
 0x30a   : > { %454 = vst [vmem:[%s242_s13] sm:$0xff] %v450_v43  ;;  %455 = vst [vmem:[%s242_s13 + $0x8] sm:$0xff] %v451_v44 }
 0x30b   : > { %v449_v45 = vpop.permute.xlu1 %448 }
 0x30c   : > { %v452_v46 = vmul.f32 %v449_v45, %v886_v2  ;;  %v453_v47 = vmul.f32 %v449_v45, %v890_v4 }
 0x30e   : > { %456 = vst [vmem:[%s242_s13 + $0x10] sm:$0xff] %v452_v46  ;;  %457 = vst [vmem:[%s242_s13 + $0x18] sm:$0xff] %v453_v47 }
 0x30f   : > { %684 = shalt.err (!%p681_p10)
}
 0x310   : > { %s685_s8 = scalar_lea.hbm %s919_s25, 512  ;;  %s689_s10 = scalar_lea.hbm %s969_s5, 1024 }
 0x311   : > { %p686_p0 = scmp.ne.s32.totalorder %s919_s25, %s685_s8  ;;  %p690_p1 = scmp.lt.s32.totalorder %s919_s25, %s969_s5 }
 0x312   : > { %p691_p3 = scmp.lt.s32.totalorder %s689_s10, %s685_s8 }
 0x313   : > { %p687_p2 = pnand %p686_p0, %p978_p12 }
 0x314   : > { %p692_p6 = por %p691_p3, %p690_p1 }
 0x315   : > { %p688_p9 = pneg %p687_p2 }
 0x317   : > { %p693_p11 = pnand %p692_p6, %p688_p9 }
 0x319   : > { %696 = shalt.err (!%p693_p11)
}
 0x31a   : > { %s743_s26 = smov 256   ;;  %s744_s28 = smov 16  }
 0x31b   : > { %585 = dma.vmem_to_hbm [thread:$0]  (%p978_p12), %s914_s17, 512, %s919_s25, %s459_s22, %s743_s26, %s743_s26, %s744_s28  }
 0x31c PF: > { %s487_s29 = sand.u32 1, %s723_s18   ;;  %p979_p13 = scmp.ne.s32.totalorder %s975_s6, 0 }
 0x31d   : > { %p980_p4 = scmp.ge.s32.totalorder %s735_s21, 2  ;;  %s488_s12 = scalar_lea.sflag [#allocation4], %s487_s29 }
 0x31f   : > { %p592_p5 = pnand %p980_p4, %p979_p13 }
 0x321   : > { %p593_p7 = pneg %p592_p5 }
 0x323   : > { %718 = dma.done.wait (%p593_p7), %s488_s12, 512  }
 0x324   : > { %720 = vsyncadd (%p593_p7), %s488_s12, 4294966784  ;;  %p18_p8 = scmp.ge.s32.totalorder %s800_s24, 4   ;;  %s981_s18 = smov %s727_s19 }
 0x325   : > { %s982_s19 = smov %s731_s20  ;;  %s983_s20 = smov %s812_s27 }
 0x326   : > { %s984_s21 = smov %s800_s24  ;;  %20 = sbr.rel (!%p18_p8) target bundleno = 5 (0x5), region = 85 }
 0x32b   :  { %493 = vsyncpa [#allocation3], 1 }
 0x32c   :  { %495 = vsyncpa [#allocation3 + $0x1], 1 }
 0x32d   :  { %496 = vsyncpa [#allocation4], 1 }
 0x32e   :  { %498 = vsyncpa [#allocation4 + $0x1], 1 }

</bundles_post_ra>
